<compile_context>
chip_gen: v6e
topology: v6e:2x2x1
jax: 0.10.0
libtpu: 0.0.40
codegen_flags: <defaults>
</compile_context>

<pallas_src>
import jax
import jax.numpy as jnp
from jax.experimental import pallas as pl
from jax.experimental.pallas import tpu as pltpu


def _global_maxpool_kernel(h_ref, v_ref):
    # h_ref: (C, tS) spatial slab of one batch element (C on sublanes, S on lanes)
    # v_ref: (C, 1)  per-batch pooled max, resident in VMEM across the spatial axis
    s = pl.program_id(1)
    tile_max = jnp.max(h_ref[...], axis=1, keepdims=True)   # (C, 1)

    @pl.when(s == 0)
    def _init():
        v_ref[...] = tile_max

    @pl.when(s != 0)
    def _accum():
        v_ref[...] = jnp.maximum(v_ref[...], tile_max)


def _classifier_kernel(v_ref, wt_ref, y_ref):
    # v_ref: (B, C) pooled features; wt_ref: (C, NC); y_ref: (B, NC)
    y_ref[...] = jnp.dot(v_ref[...], wt_ref[...],
                         preferred_element_type=jnp.float32).astype(y_ref.dtype)


def _pick_spatial_tile(S, C, itemsize):
    """Largest spatial tile (multiple of 128 dividing S, or full S) whose
    double-buffered (C, tS) input slab stays well inside VMEM on v5e/v6e/v7x."""
    per_buffer_budget = 6 * 1024 * 1024   # ~12 MiB double-buffered
    if S * C * itemsize <= per_buffer_budget:
        return S
    max_ts = max(128, (per_buffer_budget // (C * itemsize)) // 128 * 128)
    start = (min(max_ts, S) // 128) * 128
    for ts in range(start, 127, -128):
        if S % ts == 0:
            return ts
    # TODO(synk): S has no 128-multiple divisor; fall back to the full spatial
    # extent (block is full-dim so it stays legal, but may exceed the budget
    # for extreme shapes).
    return S


def multi_sequence_channels_forward(h_ncdhw, classifier_w):
    """h_ncdhw: (B, C, D, H, W) backbone feature map; classifier_w: (num_classes, C).

    Returns y_hat = Linear(bias=False)(AdaptiveMaxPool3d(1)(h).squeeze()).
    """
    # TODO(synk): MRIResNet3D_wls_right (the 3D-ResNet backbone) is not defined
    # in the reference source; this consumes its output feature map `h`.
    B, C, D, H, W = h_ncdhw.shape
    NC, C2 = classifier_w.shape
    assert C == C2
    S = D * H * W

    # Free reshape: collapse contiguous trailing spatial dims (no transpose/copy).
    h = h_ncdhw.reshape(B, C, S)

    tS = _pick_spatial_tile(S, C, h.dtype.itemsize)
    s_tiles = pl.cdiv(S, tS)

    pooled = pl.pallas_call(
        _global_maxpool_kernel,
        out_shape=jax.ShapeDtypeStruct((B, C, 1), h.dtype),
        grid_spec=pltpu.PrefetchScalarGridSpec(
            num_scalar_prefetch=0,
            grid=(B, s_tiles),
            in_specs=[
                pl.BlockSpec((pl.Squeezed(), C, tS), lambda b, s: (b, 0, s)),
            ],
            out_specs=pl.BlockSpec((pl.Squeezed(), C, 1), lambda b, s: (b, 0, 0)),
        ),
        compiler_params=pltpu.CompilerParams(
            dimension_semantics=("parallel", "arbitrary"),
            vmem_limit_bytes=32 * 1024 * 1024,
        ),
    )(h)

    v = pooled.reshape(B, C)              # pooled hidden activations (tiny)
    wt = jnp.transpose(classifier_w)      # (C, NC): ~2 KiB, not on the hot path
    out_dtype = jnp.result_type(h.dtype, classifier_w.dtype)

    # Single batched matmul, one grid-less Pallas invocation (full-array blocks).
    y_hat = pl.pallas_call(
        _classifier_kernel,
        out_shape=jax.ShapeDtypeStruct((B, NC), out_dtype),
    )(v, wt)
    return y_hat


if __name__ == "__main__":
    # Shapes consistent with the module:
    #   inplanes=16, wide_factor=1 -> hidden = inplanes*8*wide_factor = 128
    #   num_classes=4, batch=2, backbone output spatial map 4x4x4.
    B, C_FEAT, D, H, W = 2, 128, 4, 4, 4
    NUM_CLASSES = 4

    key = jax.random.PRNGKey(0)
    k_h, k_w = jax.random.split(key)

    # Deterministic stand-in for the backbone output and the bias-free
    # classifier weight (nn.Linear(128, 4, bias=False)).
    h = jax.random.normal(k_h, (B, C_FEAT, D, H, W), dtype=jnp.float32)
    classifier_w = (jax.random.normal(k_w, (NUM_CLASSES, C_FEAT), dtype=jnp.float32)
                    * (1.0 / jnp.sqrt(C_FEAT)))

    y_hat = multi_sequence_channels_forward(h, classifier_w)
    y_hat = jax.block_until_ready(y_hat)

    # Pure-JAX reference: AdaptiveMaxPool3d(1) == global max over (D,H,W); then x @ W.T
    v_ref = jnp.max(h.reshape(B, C_FEAT, -1), axis=-1)          # (B, C)
    y_ref = v_ref @ classifier_w.T                               # (B, NC)
    assert y_hat.shape == (B, NUM_CLASSES)
    assert jnp.allclose(y_hat, y_ref, atol=1e-5, rtol=1e-5)

    print("KERNEL_OK")
</pallas_src>

<mosaic_0001>
module attributes {stable_mosaic.version = 11 : i64} {
  func.func @_global_maxpool_kernel(%arg0: i32, %arg1: i32, %arg2: memref<1x128x64xf32, #tpu.memory_space<vmem>>, %arg3: memref<1x128x1xf32, #tpu.memory_space<vmem>>) attributes {dimension_semantics = [#tpu.dimension_semantics<parallel>, #tpu.dimension_semantics<arbitrary>], iteration_bounds = array<i64: 2, 1>, scalar_prefetch = 0 : i64, scratch_operands = 0 : i64, tpu.core_type = #tpu.core_type<tc>, window_params = [{transform_indices = @transform_0, window_bounds = array<i64: 1, 128, 64>}, {transform_indices = @transform_1, window_bounds = array<i64: 1, 128, 1>}]} {
    %c0 = arith.constant 0 : index
    %c0_0 = arith.constant 0 : index
    %c0_1 = arith.constant 0 : index
    %0 = vector.load %arg2[%c0, %c0_0, %c0_1] : memref<1x128x64xf32, #tpu.memory_space<vmem>>, vector<1x128x64xf32>
    %1 = vector.shape_cast %0 : vector<1x128x64xf32> to vector<128x64xf32>
    %cst = arith.constant dense<0xFF800000> : vector<128xf32>
    %2 = vector.multi_reduction <maximumf>, %1, %cst [1] : vector<128x64xf32> to vector<128xf32>
    %3 = vector.shape_cast %2 : vector<128xf32> to vector<128x1xf32>
    %c0_i32 = arith.constant 0 : i32
    %4 = arith.cmpi eq, %arg1, %c0_i32 : i32
    %5 = arith.extui %4 : i1 to i32
    %c0_i32_2 = arith.constant 0 : i32
    %6 = arith.cmpi ne, %5, %c0_i32_2 : i32
    scf.if %6 {
      %c0_5 = arith.constant 0 : index
      %c0_6 = arith.constant 0 : index
      %c0_7 = arith.constant 0 : index
      %10 = vector.load %arg3[%c0_5, %c0_6, %c0_7] : memref<1x128x1xf32, #tpu.memory_space<vmem>>, vector<1x128x1xf32>
      %11 = vector.shape_cast %10 : vector<1x128x1xf32> to vector<128x1xf32>
      %12 = vector.shape_cast %3 : vector<128x1xf32> to vector<1x128x1xf32>
      tpu.vector_store %arg3[%c0_5, %c0_6, %c0_7], %12 {strides = array<i32>} : memref<1x128x1xf32, #tpu.memory_space<vmem>>, vector<1x128x1xf32>,
    } else {
    }
    %c0_i32_3 = arith.constant 0 : i32
    %7 = arith.cmpi ne, %arg1, %c0_i32_3 : i32
    %8 = arith.extui %7 : i1 to i32
    %c0_i32_4 = arith.constant 0 : i32
    %9 = arith.cmpi ne, %8, %c0_i32_4 : i32
    scf.if %9 {
      %c0_5 = arith.constant 0 : index
      %c0_6 = arith.constant 0 : index
      %c0_7 = arith.constant 0 : index
      %10 = vector.load %arg3[%c0_5, %c0_6, %c0_7] : memref<1x128x1xf32, #tpu.memory_space<vmem>>, vector<1x128x1xf32>
      %11 = vector.shape_cast %10 : vector<1x128x1xf32> to vector<128x1xf32>
      %12 = arith.maximumf %11, %3 : vector<128x1xf32>
      %c0_8 = arith.constant 0 : index
      %c0_9 = arith.constant 0 : index
      %c0_10 = arith.constant 0 : index
      %13 = vector.load %arg3[%c0_8, %c0_9, %c0_10] : memref<1x128x1xf32, #tpu.memory_space<vmem>>, vector<1x128x1xf32>
      %14 = vector.shape_cast %13 : vector<1x128x1xf32> to vector<128x1xf32>
      %15 = vector.shape_cast %12 : vector<128x1xf32> to vector<1x128x1xf32>
      tpu.vector_store %arg3[%c0_8, %c0_9, %c0_10], %15 {strides = array<i32>} : memref<1x128x1xf32, #tpu.memory_space<vmem>>, vector<1x128x1xf32>,
    } else {
    }
    return
  }
  func.func @transform_0(%arg0: i32, %arg1: i32) -> (i32, i32, i32) {
    %c0_i32 = arith.constant 0 : i32
    %c0_i32_0 = arith.constant 0 : i32
    return %arg0, %c0_i32, %arg1 : i32, i32, i32
  }
  func.func @transform_1(%arg0: i32, %arg1: i32) -> (i32, i32, i32) {
    %c0_i32 = arith.constant 0 : i32
    %c0_i32_0 = arith.constant 0 : i32
    %c0_i32_1 = arith.constant 0 : i32
    return %arg0, %c0_i32, %c0_i32_0 : i32, i32, i32
  }
}

</mosaic_0001>

<bundles_post_ra>
// kernel: tpu_custom_call.1
= control target key start
LH: loop header
LB: loop body
LE: loop exit
PB: predicated region body
PF: predicated region fallthrough
CT: control target
= control target key end

     0   :  { %s419_s6 = smov 0   ;;  %s421_s7 = smov 0   ;;  %s527_s0 = inlined_call_operand.vmem [shape: f32[2,128,64], index: 0, kind: input, shape index: {}]   ;;  %s528_s1 = inlined_call_operand.vmem [shape: f32[2,128,1], index: 1, kind: output, shape index: {}]  }
   0x1   :  { %s423_s8 = smov 0  }
   0x2 LB: > { %s23_s9 = sadd.s32 1, %s403_s7  ;;  %p352_p0 = scmp.ge.s32.totalorder %s407_s8, 1  ;;  %s407_s8 = sphi %s423_s8, %s11_s8   ;;  %s403_s7 = sphi %s421_s7, %s530_s7   ;;  %s399_s6 = sphi %s419_s6, %s529_s6  }
   0x3   : > { %p25_p1 = scmp.ge.s32.totalorder %s23_s9, 2  ;;  %p104_p2 = scmp.lt.s32.totalorder %s407_s8, 3 }
   0x5   : > { %s532_s9 = smov (%p25_p1, %s23_s9), 0  ;;  %p105_p3 = pnand %p352_p0, %p104_p2 }
   0x6   : > { %p127_p4 = scmp.lt.s32.totalorder (!%p105_p3), %s399_s6, 1 }
   0x7   : > { %108 = sbr.rel (%p105_p3) target bundleno = 184 (0xb8), region = 24 }
   0xc   : > { %s534_s6 = smov (!%p127_p4, %s399_s6), 1  ;;  %vm156_vm0 = vcmask 523264   ;;  %vm209_vm1 = vcmask 7168  }
   0xd   : > { %s359_s10 = sshll.u32 %s534_s6, 7 }
   0xe   : > { %s445_s13 = scalar_lea.vmem %s527_s0, %s359_s10  ;;  %s484_s16 = scalar_lea.vmem %s528_s1, %s359_s10 }
   0xf   : > { %v142_v0 = vld [vmem:[%s445_s13 + $0x10] sm:$0xff]  ;;  %v140_v1 = vld [vmem:[%s445_s13] sm:$0xff]  ;;  %v143_v2 = vld [vmem:[%s445_s13 + $0x18] sm:$0xff] }
  0x10   : > { %v163_v3 = vsel %vm156_vm0, %v142_v0, -inf  ;;  %v157_v4 = vsel %vm156_vm0, %v140_v1, -inf  ;;  %v141_v5 = vld [vmem:[%s445_s13 + $0x8] sm:$0xff]  ;;  %v166_v6 = vsel %vm156_vm0, %v143_v2, -inf  ;;  %v144_v9 = vld [vmem:[%s445_s13 + $0x20] sm:$0xff]  ;;  %v147_v12 = vld [vmem:[%s445_s13 + $0x38] sm:$0xff] }
  0x11   : > { %164 = vmax.xlane.f32.xlu1 %v163_v3  ;;  %158 = vmax.xlane.f32.xlu0 %v157_v4  ;;  %v160_v7 = vsel %vm156_vm0, %v141_v5, -inf  ;;  %v145_v8 = vld [vmem:[%s445_s13 + $0x28] sm:$0xff]  ;;  %v169_v11 = vsel %vm156_vm0, %v144_v9, -inf  ;;  %v146_v13 = vld [vmem:[%s445_s13 + $0x30] sm:$0xff]  ;;  %v178_v14 = vsel %vm156_vm0, %v147_v12, -inf  ;;  %v148_v17 = vld [vmem:[%s445_s13 + $0x40] sm:$0xff] }
  0x12   : > { %v172_v10 = vsel %vm156_vm0, %v145_v8, -inf  ;;  %v175_v15 = vsel %vm156_vm0, %v146_v13, -inf  ;;  %v149_v16 = vld [vmem:[%s445_s13 + $0x48] sm:$0xff]  ;;  %v181_v19 = vsel %vm156_vm0, %v148_v17, -inf  ;;  %v151_v20 = vld [vmem:[%s445_s13 + $0x58] sm:$0xff]  ;;  %v150_v21 = vld [vmem:[%s445_s13 + $0x50] sm:$0xff] }
  0x13   : > { %v184_v18 = vsel %vm156_vm0, %v149_v16, -inf  ;;  %v190_v22 = vsel %vm156_vm0, %v151_v20, -inf  ;;  %v187_v23 = vsel %vm156_vm0, %v150_v21, -inf  ;;  %v153_v24 = vld [vmem:[%s445_s13 + $0x68] sm:$0xff]  ;;  %v152_v25 = vld [vmem:[%s445_s13 + $0x60] sm:$0xff]  ;;  %v155_v28 = vld [vmem:[%s445_s13 + $0x78] sm:$0xff] }
  0x14   : > { %v196_v26 = vsel %vm156_vm0, %v153_v24, -inf  ;;  %v193_v27 = vsel %vm156_vm0, %v152_v25, -inf  ;;  %v154_v29 = vld [vmem:[%s445_s13 + $0x70] sm:$0xff]  ;;  %v202_v30 = vsel %vm156_vm0, %v155_v28, -inf }
  0x15   : > { %167 = vmax.xlane.f32.xlu1 %v166_v6  ;;  %161 = vmax.xlane.f32.xlu0 %v160_v7  ;;  %v199_v31 = vsel %vm156_vm0, %v154_v29, -inf }
  0x19   : > { %173 = vmax.xlane.f32.xlu1 %v172_v10  ;;  %170 = vmax.xlane.f32.xlu0 %v169_v11 }
  0x1d   : > { %179 = vmax.xlane.f32.xlu1 %v178_v14  ;;  %176 = vmax.xlane.f32.xlu0 %v175_v15 }
  0x21   : > { %185 = vmax.xlane.f32.xlu1 %v184_v18  ;;  %182 = vmax.xlane.f32.xlu0 %v181_v19 }
  0x25   : > { %191 = vmax.xlane.f32.xlu1 %v190_v22  ;;  %188 = vmax.xlane.f32.xlu0 %v187_v23 }
  0x29   : > { %197 = vmax.xlane.f32.xlu1 %v196_v26  ;;  %194 = vmax.xlane.f32.xlu0 %v193_v27 }
  0x2d   : > { %203 = vmax.xlane.f32.xlu1 %v202_v30  ;;  %200 = vmax.xlane.f32.xlu0 %v199_v31 }
  0x9a   : > { %v165_v32 = vpop.xlane.xlu1 %164  ;;  %v159_v33 = vpop.xlane.xlu0 %158 }
  0x9b   : > { %212 = vst.msk [vmem:[%s484_s16 + $0x10] sm:$0xff] %vm209_vm1, %v165_v32  ;;  %210 = vst.msk [vmem:[%s484_s16] sm:$0xff] %vm209_vm1, %v159_v33 }
  0x9e   : > { %v168_v34 = vpop.xlane.xlu1 %167  ;;  %v162_v35 = vpop.xlane.xlu0 %161 }
  0x9f   : > { %213 = vst.msk [vmem:[%s484_s16 + $0x18] sm:$0xff] %vm209_vm1, %v168_v34  ;;  %211 = vst.msk [vmem:[%s484_s16 + $0x8] sm:$0xff] %vm209_vm1, %v162_v35 }
  0xa2   : > { %v174_v36 = vpop.xlane.xlu1 %173  ;;  %v171_v37 = vpop.xlane.xlu0 %170 }
  0xa3   : > { %215 = vst.msk [vmem:[%s484_s16 + $0x28] sm:$0xff] %vm209_vm1, %v174_v36  ;;  %214 = vst.msk [vmem:[%s484_s16 + $0x20] sm:$0xff] %vm209_vm1, %v171_v37 }
  0xa6   : > { %v180_v38 = vpop.xlane.xlu1 %179  ;;  %v177_v39 = vpop.xlane.xlu0 %176 }
  0xa7   : > { %217 = vst.msk [vmem:[%s484_s16 + $0x38] sm:$0xff] %vm209_vm1, %v180_v38  ;;  %216 = vst.msk [vmem:[%s484_s16 + $0x30] sm:$0xff] %vm209_vm1, %v177_v39 }
  0xaa   : > { %v186_v40 = vpop.xlane.xlu1 %185  ;;  %v183_v41 = vpop.xlane.xlu0 %182 }
  0xab   : > { %219 = vst.msk [vmem:[%s484_s16 + $0x48] sm:$0xff] %vm209_vm1, %v186_v40  ;;  %218 = vst.msk [vmem:[%s484_s16 + $0x40] sm:$0xff] %vm209_vm1, %v183_v41 }
  0xae   : > { %v192_v42 = vpop.xlane.xlu1 %191  ;;  %v189_v43 = vpop.xlane.xlu0 %188 }
  0xaf   : > { %221 = vst.msk [vmem:[%s484_s16 + $0x58] sm:$0xff] %vm209_vm1, %v192_v42  ;;  %220 = vst.msk [vmem:[%s484_s16 + $0x50] sm:$0xff] %vm209_vm1, %v189_v43 }
  0xb2   : > { %v198_v44 = vpop.xlane.xlu1 %197  ;;  %v195_v45 = vpop.xlane.xlu0 %194 }
  0xb3   : > { %223 = vst.msk [vmem:[%s484_s16 + $0x68] sm:$0xff] %vm209_vm1, %v198_v44  ;;  %222 = vst.msk [vmem:[%s484_s16 + $0x60] sm:$0xff] %vm209_vm1, %v195_v45 }
  0xb6   : > { %v204_v46 = vpop.xlane.xlu1 %203  ;;  %v201_v47 = vpop.xlane.xlu0 %200 }
  0xb7   : > { %225 = vst.msk [vmem:[%s484_s16 + $0x78] sm:$0xff] %vm209_vm1, %v204_v46  ;;  %224 = vst.msk [vmem:[%s484_s16 + $0x70] sm:$0xff] %vm209_vm1, %v201_v47 }
  0xb8 PF: > { %s11_s8 = sadd.s32 1, %s407_s8   ;;  %s529_s6 = smov %s403_s7 }
  0xb9   : > { %p8_p5 = scmp.ge.s32.totalorder %s11_s8, 4   ;;  %s530_s7 = smov %s532_s9 }
  0xbb   :  { %10 = sbr.rel (!%p8_p5) target bundleno = 2 (0x2), region = 62 }

</bundles_post_ra>
